<compile_context>
chip_gen: v7x
topology: tpu7x:2x2x1
jax: 0.10.0
libtpu: 0.0.40
codegen_flags: <defaults>
</compile_context>

<pallas_src>
import functools
import math

import jax
import jax.numpy as jnp
import numpy as np
from jax.experimental import pallas as pl
from jax.experimental.pallas import tpu as pltpu


# ----------------------------------------------------------------------------
# Fused Pallas kernel: predictor + target in one pass over a batch tile.
# ----------------------------------------------------------------------------
def _rnd_fused_kernel(s_ref, w1_ref, wmain_ref, wtail_ref, bias_ref,
                      out_ref, h_ref, *, hidden_size, output_size, num_hidden):
    # TODO(synk): the module's `activation` argument is fixed to ReLU here.
    relu = lambda v: jnp.maximum(v, 0.0)
    h2 = 2 * hidden_size
    o2 = 2 * output_size
    wdt = w1_ref.dtype                       # f32 or bf16 (MXU operands only)

    def dot(a, b):
        return jnp.dot(a.astype(wdt), b, preferred_element_type=jnp.float32)

    # Layer 1: [target | predictor] packed along the lane axis (2h = lane-dense).
    h_ref[...] = relu(dot(s_ref[...], w1_ref[...]) + bias_ref[0:1, :h2])

    # (L-2) hidden layers, block-diagonal packed: one matmul drives both MLPs.
    for i in range(num_hidden):
        z = dot(h_ref[...], wmain_ref[i])
        if z.shape[-1] != h2:                # only if output_size > hidden_size
            z = z[:, :h2]
        h_ref[...] = relu(z + bias_ref[1 + i:2 + i, :h2])

    # (hidden -> output) layer, block-diagonal packed; target occupies lanes
    # [0:o) so the target feature is a lane-0-aligned prefix of y.
    y = dot(h_ref[...], wmain_ref[num_hidden])[:, :o2] \
        + bias_ref[num_hidden + 1:num_hidden + 2, :o2]

    # Predictor tail: act, Linear(o,o), act, Linear(o,o).  Tail weights are
    # zero-padded to (2o, 2o) so both matmuls consume the whole packed slab —
    # the relu'd target lanes hit zero rows/columns, so no lane slicing needed.
    p = relu(dot(relu(y), wtail_ref[0])
             + bias_ref[num_hidden + 2:num_hidden + 3, :o2])
    pred = dot(p, wtail_ref[1]) + bias_ref[num_hidden + 3:num_hidden + 4, :o2]

    # Single lane-packed store: lanes [0:o) = target, lanes [o:2o) = predictor.
    lane = jax.lax.broadcasted_iota(jnp.int32, (y.shape[0], o2), 1)
    out_ref[...] = jnp.where(lane < output_size, y, pred)


# ----------------------------------------------------------------------------
# Pallas wrapper
# ----------------------------------------------------------------------------
def rnd_forward(params, s, *, batch_tile=1024):
    """s: (B, input_size) -> (predict_feature, target_feature), each (B, O)."""
    s = jnp.asarray(s, jnp.float32)
    B, in_size = s.shape
    w1, wmain = params["w1"], params["wmain"]
    wtail, biases = params["wtail"], params["biases"]

    h2 = w1.shape[1]
    hidden_size = h2 // 2
    o2 = wtail.shape[-1]
    output_size = o2 // 2
    num_hidden = wmain.shape[0] - 1
    wide = wmain.shape[-1]

    # Batch tile: multiple of 256 rows (fills MXU rows on v6e/v7x, ok on v5e)
    # and small enough that double-buffered s/out tiles + h scratch + resident
    # weights stay well inside every generation's scoped-VMEM default.
    if B <= batch_tile:
        tb = B                               # single tile == full array
    else:
        tb = batch_tile                      # 1024: multiple of 256
    num_tiles = pl.cdiv(B, tb)
    b_pad = num_tiles * tb
    if b_pad != B:
        s = jnp.pad(s, ((0, b_pad - B), (0, 0)))

    kernel = functools.partial(_rnd_fused_kernel, hidden_size=hidden_size,
                               output_size=output_size, num_hidden=num_hidden)

    flops = 2 * b_pad * (in_size * h2 + num_hidden * h2 * wide
                         + h2 * wide + 2 * o2 * o2)
    bytes_accessed = int(
        s.size * 4
        + sum(int(a.size) * a.dtype.itemsize for a in (w1, wmain, wtail, biases))
        + b_pad * o2 * 4)

    out = pl.pallas_call(
        kernel,
        out_shape=jax.ShapeDtypeStruct((b_pad, o2), jnp.float32),
        grid_spec=pltpu.PrefetchScalarGridSpec(
            num_scalar_prefetch=0,
            grid=(num_tiles,),
            in_specs=[
                pl.BlockSpec((tb, in_size), lambda i: (i, 0)),
                pl.BlockSpec(w1.shape, lambda i: (0, 0)),
                pl.BlockSpec(wmain.shape, lambda i: (0, 0, 0)),
                pl.BlockSpec(wtail.shape, lambda i: (0, 0, 0)),
                pl.BlockSpec(biases.shape, lambda i: (0, 0)),
            ],
            out_specs=pl.BlockSpec((tb, o2), lambda i: (i, 0)),
            scratch_shapes=[pltpu.VMEM((tb, h2), jnp.float32)],
        ),
        compiler_params=pltpu.CompilerParams(
            dimension_semantics=("parallel",)),
        cost_estimate=pl.CostEstimate(flops=flops, transcendentals=0,
                                      bytes_accessed=bytes_accessed),
    )(s, w1, wmain, wtail, biases)

    pred = out[:B, output_size:]
    tgt = out[:B, :output_size]
    return pred, tgt


# ----------------------------------------------------------------------------
# Parameter init (orthogonal, gain sqrt(2), zero bias — matches the module)
# and predictor/target weight packing done once at init (zero runtime cost).
# ----------------------------------------------------------------------------
def _orthogonal(rng, out_dim, in_dim, gain):
    n, m = max(out_dim, in_dim), min(out_dim, in_dim)
    a = rng.standard_normal((n, m)).astype(np.float32)
    q, r = np.linalg.qr(a)
    d = np.sign(np.diag(r))
    d[d == 0] = 1.0                                # safeguard vs zero diag
    q = q * d
    w = q if out_dim >= in_dim else q.T
    return (gain * w).astype(np.float32)           # torch layout (out, in)


def make_params(input_size, hidden_size, output_size, num_layers, seed=42,
                param_dtype=jnp.float32):
    """param_dtype=jnp.bfloat16 gives MXU-native operands on v6e/v7x."""
    assert num_layers >= 2
    rng = np.random.RandomState(seed)
    gain = math.sqrt(2.0)
    nh = num_layers - 2

    def linear(out_d, in_d):
        w = _orthogonal(rng, out_d, in_d, gain)
        # matmul layout (in, out) = torch_weight.T ; bias zero like the module
        return w.T.copy(), np.zeros((out_d,), np.float32)

    pred = [linear(hidden_size, input_size)]
    pred += [linear(hidden_size, hidden_size) for _ in range(nh)]
    pred += [linear(output_size, hidden_size),
             linear(output_size, output_size),
             linear(output_size, output_size)]
    tgt = [linear(hidden_size, input_size)]
    tgt += [linear(hidden_size, hidden_size) for _ in range(nh)]
    tgt += [linear(output_size, hidden_size)]

    h2, o2 = 2 * hidden_size, 2 * output_size
    wide = max(h2, o2)

    def cat_lane(t, p):
        row = np.zeros((wide,), np.float32)
        row[:t.shape[0] + p.shape[0]] = np.concatenate([t, p])
        return row

    # Layer 1: target lanes first, predictor lanes second.          (in, 2h)
    w1 = np.concatenate([tgt[0][0], pred[0][0]], axis=1)

    # Hidden layers + (hidden->output), stacked:        (num_layers-1, 2h, wide)
    wmain = np.zeros((num_layers - 1, h2, wide), np.float32)
    for i in range(nh):
        wmain[i, :hidden_size, :hidden_size] = tgt[1 + i][0]
        wmain[i, hidden_size:, hidden_size:h2] = pred[1 + i][0]
    wmain[nh, :hidden_size, :output_size] = tgt[1 + nh][0]
    wmain[nh, hidden_size:, output_size:o2] = pred[1 + nh][0]

    # Predictor tail weights, zero-padded to the packed slab:    (2, 2o, 2o)
    wtail = np.zeros((2, o2, o2), np.float32)
    wtail[0, output_size:, :output_size] = pred[2 + nh][0]   # pred lanes -> [0:o)
    wtail[1, :output_size, output_size:] = pred[3 + nh][0]   # [0:o) -> pred lanes

    # All biases in one lane-0-aligned buffer:           (num_layers + 2, wide)
    biases = np.zeros((num_layers + 2, wide), np.float32)
    biases[0] = cat_lane(tgt[0][1], pred[0][1])
    for i in range(nh):
        biases[1 + i] = cat_lane(tgt[1 + i][1], pred[1 + i][1])
    biases[1 + nh] = cat_lane(tgt[1 + nh][1], pred[1 + nh][1])
    biases[2 + nh, :output_size] = pred[2 + nh][1]
    biases[3 + nh, output_size:o2] = pred[3 + nh][1]

    packed = {
        "w1": jnp.asarray(w1, param_dtype),
        "wmain": jnp.asarray(wmain, param_dtype),
        "wtail": jnp.asarray(wtail, param_dtype),
        "biases": jnp.asarray(biases, jnp.float32),   # bias add stays f32
    }
    raw = {"pred": [(jnp.asarray(w), jnp.asarray(b)) for w, b in pred],
           "target": [(jnp.asarray(w), jnp.asarray(b)) for w, b in tgt]}
    return packed, raw


# ----------------------------------------------------------------------------
# Pure-JAX reference (unpacked weights) for correctness validation
# ----------------------------------------------------------------------------
def ref_forward(raw, s):
    act = lambda v: jnp.maximum(v, 0.0)
    hp = jax.lax.Precision.HIGHEST

    def mlp(layers, x):
        for w, b in layers[:-1]:
            x = act(jnp.dot(x, w, precision=hp) + b)
        w, b = layers[-1]
        return jnp.dot(x, w, precision=hp) + b

    return mlp(raw["pred"], s), mlp(raw["target"], s)


# ----------------------------------------------------------------------------
if __name__ == "__main__":
    B, IN, HID, OUT, L = 8, 64, 64, 32, 3
    packed, raw = make_params(IN, HID, OUT, L)

    s = jax.random.normal(jax.random.PRNGKey(0), (B, IN), dtype=jnp.float32)

    fwd = jax.jit(rnd_forward)
    pred, tgt = fwd(packed, s)
    jax.block_until_ready((pred, tgt))

    assert pred.shape == (B, OUT) and tgt.shape == (B, OUT)
    assert pred.dtype == jnp.float32 and tgt.dtype == jnp.float32

    pred_ref, tgt_ref = ref_forward(raw, s)
    assert jnp.allclose(pred, pred_ref, rtol=1e-2, atol=1e-2)
    assert jnp.allclose(tgt, tgt_ref, rtol=1e-2, atol=1e-2)

    print("KERNEL_OK")
</pallas_src>

<mosaic_0001>
module attributes {stable_mosaic.version = 11 : i64} {
  func.func @_rnd_fused_kernel(%arg0: i32, %arg1: memref<8x64xf32, #tpu.memory_space<vmem>>, %arg2: memref<64x128xf32, #tpu.memory_space<vmem>>, %arg3: memref<2x128x128xf32, #tpu.memory_space<vmem>>, %arg4: memref<2x64x64xf32, #tpu.memory_space<vmem>>, %arg5: memref<5x128xf32, #tpu.memory_space<vmem>>, %arg6: memref<8x64xf32, #tpu.memory_space<vmem>>, %arg7: memref<8x128xf32, #tpu.memory_space<vmem>>) attributes {dimension_semantics = [#tpu.dimension_semantics<parallel>], iteration_bounds = array<i64: 1>, scalar_prefetch = 0 : i64, scratch_operands = 1 : i64, tpu.core_type = #tpu.core_type<tc>, window_params = [{transform_indices = @transform_0, window_bounds = array<i64: 8, 64>}, {pipeline_mode = #tpu.pipeline_mode<synchronous>, transform_indices = @transform_1, window_bounds = array<i64: 64, 128>}, {pipeline_mode = #tpu.pipeline_mode<synchronous>, transform_indices = @transform_2, window_bounds = array<i64: 2, 128, 128>}, {pipeline_mode = #tpu.pipeline_mode<synchronous>, transform_indices = @transform_3, window_bounds = array<i64: 2, 64, 64>}, {pipeline_mode = #tpu.pipeline_mode<synchronous>, transform_indices = @transform_4, window_bounds = array<i64: 5, 128>}, {transform_indices = @transform_5, window_bounds = array<i64: 8, 64>}]} {
    %c0 = arith.constant 0 : index
    %c0_0 = arith.constant 0 : index
    %0 = vector.load %arg1[%c0, %c0_0] : memref<8x64xf32, #tpu.memory_space<vmem>>, vector<8x64xf32>
    %c0_1 = arith.constant 0 : index
    %c0_2 = arith.constant 0 : index
    %1 = vector.load %arg2[%c0_1, %c0_2] : memref<64x128xf32, #tpu.memory_space<vmem>>, vector<64x128xf32>
    %cst = arith.constant dense<0.000000e+00> : vector<8x128xf32>
    %2 = tpu.matmul %0, %1, %cst {dimension_numbers = #tpu.dot_dimension_numbers<[1], [0], [0], [1], [0, 0, 1, 1], [], []>} : vector<8x64xf32>, vector<64x128xf32>, vector<8x128xf32> -> vector<8x128xf32>
    %c0_3 = arith.constant 0 : index
    %c0_4 = arith.constant 0 : index
    %3 = vector.load %arg5[%c0_3, %c0_4] : memref<5x128xf32, #tpu.memory_space<vmem>>, vector<1x128xf32>
    %4 = vector.broadcast %3 : vector<1x128xf32> to vector<8x128xf32>
    %5 = arith.addf %2, %4 : vector<8x128xf32>
    %cst_5 = arith.constant 0.000000e+00 : f32
    %6 = vector.broadcast %cst_5 : f32 to vector<8x128xf32>
    %7 = arith.maximumf %5, %6 : vector<8x128xf32>
    %c0_6 = arith.constant 0 : index
    %c0_7 = arith.constant 0 : index
    %8 = vector.load %arg7[%c0_6, %c0_7] : memref<8x128xf32, #tpu.memory_space<vmem>>, vector<8x128xf32>
    tpu.vector_store %arg7[%c0_6, %c0_7], %7 {strides = array<i32>} : memref<8x128xf32, #tpu.memory_space<vmem>>, vector<8x128xf32>,
    %c0_8 = arith.constant 0 : index
    %c0_9 = arith.constant 0 : index
    %9 = vector.load %arg7[%c0_8, %c0_9] : memref<8x128xf32, #tpu.memory_space<vmem>>, vector<8x128xf32>
    %c0_10 = arith.constant 0 : index
    %c0_11 = arith.constant 0 : index
    %c0_12 = arith.constant 0 : index
    %10 = vector.load %arg3[%c0_10, %c0_11, %c0_12] : memref<2x128x128xf32, #tpu.memory_space<vmem>>, vector<1x128x128xf32>
    %11 = vector.shape_cast %10 : vector<1x128x128xf32> to vector<128x128xf32>
    %cst_13 = arith.constant dense<0.000000e+00> : vector<8x128xf32>
    %12 = tpu.matmul %9, %11, %cst_13 {dimension_numbers = #tpu.dot_dimension_numbers<[1], [0], [0], [1], [0, 0, 1, 1], [], []>} : vector<8x128xf32>, vector<128x128xf32>, vector<8x128xf32> -> vector<8x128xf32>
    %c1 = arith.constant 1 : index
    %c0_14 = arith.constant 0 : index
    %13 = vector.load %arg5[%c1, %c0_14] : memref<5x128xf32, #tpu.memory_space<vmem>>, vector<1x128xf32>
    %14 = vector.broadcast %13 : vector<1x128xf32> to vector<8x128xf32>
    %15 = arith.addf %12, %14 : vector<8x128xf32>
    %cst_15 = arith.constant 0.000000e+00 : f32
    %16 = vector.broadcast %cst_15 : f32 to vector<8x128xf32>
    %17 = arith.maximumf %15, %16 : vector<8x128xf32>
    %c0_16 = arith.constant 0 : index
    %c0_17 = arith.constant 0 : index
    %18 = vector.load %arg7[%c0_16, %c0_17] : memref<8x128xf32, #tpu.memory_space<vmem>>, vector<8x128xf32>
    tpu.vector_store %arg7[%c0_16, %c0_17], %17 {strides = array<i32>} : memref<8x128xf32, #tpu.memory_space<vmem>>, vector<8x128xf32>,
    %c0_18 = arith.constant 0 : index
    %c0_19 = arith.constant 0 : index
    %19 = vector.load %arg7[%c0_18, %c0_19] : memref<8x128xf32, #tpu.memory_space<vmem>>, vector<8x128xf32>
    %c1_20 = arith.constant 1 : index
    %c0_21 = arith.constant 0 : index
    %c0_22 = arith.constant 0 : index
    %20 = vector.load %arg3[%c1_20, %c0_21, %c0_22] : memref<2x128x128xf32, #tpu.memory_space<vmem>>, vector<1x128x128xf32>
    %21 = vector.shape_cast %20 : vector<1x128x128xf32> to vector<128x128xf32>
    %cst_23 = arith.constant dense<0.000000e+00> : vector<8x128xf32>
    %22 = tpu.matmul %19, %21, %cst_23 {dimension_numbers = #tpu.dot_dimension_numbers<[1], [0], [0], [1], [0, 0, 1, 1], [], []>} : vector<8x128xf32>, vector<128x128xf32>, vector<8x128xf32> -> vector<8x128xf32>
    %23 = vector.extract_strided_slice %22 {offsets = [0, 0], sizes = [8, 64], strides = [1, 1]} : vector<8x128xf32> to vector<8x64xf32>
    %c2 = arith.constant 2 : index
    %c0_24 = arith.constant 0 : index
    %24 = vector.load %arg5[%c2, %c0_24] : memref<5x128xf32, #tpu.memory_space<vmem>>, vector<1x64xf32>
    %25 = vector.broadcast %24 : vector<1x64xf32> to vector<8x64xf32>
    %26 = arith.addf %23, %25 : vector<8x64xf32>
    %cst_25 = arith.constant 0.000000e+00 : f32
    %27 = vector.broadcast %cst_25 : f32 to vector<8x64xf32>
    %28 = arith.maximumf %26, %27 : vector<8x64xf32>
    %c0_26 = arith.constant 0 : index
    %c0_27 = arith.constant 0 : index
    %c0_28 = arith.constant 0 : index
    %29 = vector.load %arg4[%c0_26, %c0_27, %c0_28] : memref<2x64x64xf32, #tpu.memory_space<vmem>>, vector<1x64x64xf32>
    %30 = vector.shape_cast %29 : vector<1x64x64xf32> to vector<64x64xf32>
    %cst_29 = arith.constant dense<0.000000e+00> : vector<8x64xf32>
    %31 = tpu.matmul %28, %30, %cst_29 {dimension_numbers = #tpu.dot_dimension_numbers<[1], [0], [0], [1], [0, 0, 1, 1], [], []>} : vector<8x64xf32>, vector<64x64xf32>, vector<8x64xf32> -> vector<8x64xf32>
    %c3 = arith.constant 3 : index
    %c0_30 = arith.constant 0 : index
    %32 = vector.load %arg5[%c3, %c0_30] : memref<5x128xf32, #tpu.memory_space<vmem>>, vector<1x64xf32>
    %33 = vector.broadcast %32 : vector<1x64xf32> to vector<8x64xf32>
    %34 = arith.addf %31, %33 : vector<8x64xf32>
    %cst_31 = arith.constant 0.000000e+00 : f32
    %35 = vector.broadcast %cst_31 : f32 to vector<8x64xf32>
    %36 = arith.maximumf %34, %35 : vector<8x64xf32>
    %c1_32 = arith.constant 1 : index
    %c0_33 = arith.constant 0 : index
    %c0_34 = arith.constant 0 : index
    %37 = vector.load %arg4[%c1_32, %c0_33, %c0_34] : memref<2x64x64xf32, #tpu.memory_space<vmem>>, vector<1x64x64xf32>
    %38 = vector.shape_cast %37 : vector<1x64x64xf32> to vector<64x64xf32>
    %cst_35 = arith.constant dense<0.000000e+00> : vector<8x64xf32>
    %39 = tpu.matmul %36, %38, %cst_35 {dimension_numbers = #tpu.dot_dimension_numbers<[1], [0], [0], [1], [0, 0, 1, 1], [], []>} : vector<8x64xf32>, vector<64x64xf32>, vector<8x64xf32> -> vector<8x64xf32>
    %c4 = arith.constant 4 : index
    %c0_36 = arith.constant 0 : index
    %40 = vector.load %arg5[%c4, %c0_36] : memref<5x128xf32, #tpu.memory_space<vmem>>, vector<1x64xf32>
    %41 = vector.broadcast %40 : vector<1x64xf32> to vector<8x64xf32>
    %42 = arith.addf %39, %41 : vector<8x64xf32>
    %43 = tpu.iota {dimensions = array<i32: 1>} : vector<8x64xi32>
    %c32_i32 = arith.constant 32 : i32
    %44 = vector.broadcast %c32_i32 : i32 to vector<8x64xi32>
    %45 = arith.cmpi slt, %43, %44 : vector<8x64xi32>
    %46 = arith.select %45, %26, %42 : vector<8x64xi1>, vector<8x64xf32>
    %c0_37 = arith.constant 0 : index
    %c0_38 = arith.constant 0 : index
    %47 = vector.load %arg6[%c0_37, %c0_38] : memref<8x64xf32, #tpu.memory_space<vmem>>, vector<8x64xf32>
    tpu.vector_store %arg6[%c0_37, %c0_38], %46 {strides = array<i32>} : memref<8x64xf32, #tpu.memory_space<vmem>>, vector<8x64xf32>,
    return
  }
  func.func @transform_0(%arg0: i32) -> (i32, i32) {
    %c0_i32 = arith.constant 0 : i32
    %c0_i32_0 = arith.constant 0 : i32
    return %arg0, %c0_i32 : i32, i32
  }
  func.func @transform_1(%arg0: i32) -> (i32, i32) {
    %c0_i32 = arith.constant 0 : i32
    %c0_i32_0 = arith.constant 0 : i32
    %c0_i32_1 = arith.constant 0 : i32
    return %c0_i32, %c0_i32_0 : i32, i32
  }
  func.func @transform_2(%arg0: i32) -> (i32, i32, i32) {
    %c0_i32 = arith.constant 0 : i32
    %c0_i32_0 = arith.constant 0 : i32
    %c0_i32_1 = arith.constant 0 : i32
    %c0_i32_2 = arith.constant 0 : i32
    return %c0_i32, %c0_i32_0, %c0_i32_1 : i32, i32, i32
  }
  func.func @transform_3(%arg0: i32) -> (i32, i32, i32) {
    %c0_i32 = arith.constant 0 : i32
    %c0_i32_0 = arith.constant 0 : i32
    %c0_i32_1 = arith.constant 0 : i32
    %c0_i32_2 = arith.constant 0 : i32
    return %c0_i32, %c0_i32_0, %c0_i32_1 : i32, i32, i32
  }
  func.func @transform_4(%arg0: i32) -> (i32, i32) {
    %c0_i32 = arith.constant 0 : i32
    %c0_i32_0 = arith.constant 0 : i32
    %c0_i32_1 = arith.constant 0 : i32
    return %c0_i32, %c0_i32_0 : i32, i32
  }
  func.func @transform_5(%arg0: i32) -> (i32, i32) {
    %c0_i32 = arith.constant 0 : i32
    %c0_i32_0 = arith.constant 0 : i32
    return %arg0, %c0_i32 : i32, i32
  }
}

</mosaic_0001>

<bundles_post_ra>
// kernel: rnd_forward.1
= control target key start
LH: loop header
LB: loop body
LE: loop exit
PB: predicated region body
PF: predicated region fallthrough
CT: control target
= control target key end

     0   :  { %10 = vsyncpa [#allocation4], 0  ;;  %s1072_s0 = inlined_call_operand.vmem [shape: f32[8,64], index: 0, kind: input, shape index: {}]   ;;  %s1073_s1 = inlined_call_operand.hbm [shape: f32[64,128], index: 1, kind: input, shape index: {}]   ;;  %s1074_s2 = inlined_call_operand.hbm [shape: f32[2,128,128], index: 2, kind: input, shape index: {}]   ;;  %s1075_s3 = inlined_call_operand.hbm [shape: f32[2,64,64], index: 3, kind: input, shape index: {}]   ;;  %s1076_s4 = inlined_call_operand.hbm [shape: f32[5,128], index: 4, kind: input, shape index: {}]   ;;  %s1077_s5 = inlined_call_operand.vmem [shape: f32[8,64], index: 5, kind: output, shape index: {}]  }
   0x1   :  { %11 = vsyncpa [#allocation6], 0 }
   0x2   :  { %12 = vsyncpa [#allocation9], 0  ;;  %s921_s18 = smov [#allocation5]   ;;  %s922_s20 = smov [#allocation3]  }
   0x3   :  { %s32_s19 = sshll.u32 %s921_s18, 4  ;;  %s20_s21 = sshll.u32 %s922_s20, 4  ;;  %s33_s19 = int_to_ptr.vmem [resolvable:$true] %s32_s19  ;;  %s960_s21 = int_to_ptr.vmem [resolvable:$true] %s20_s21 }
   0x4   :  { %s827_s24 = scalar_lea.hbm %s1074_s2, 4096 }
   0x5   :  { %p828_p0 = scmp.ne.s32.totalorder %s1074_s2, %s827_s24  ;;  %p831_p1 = scmp.lt.u32.totalorder %s827_s24, %s1074_s2 }
   0x7   :  { %p833_p2 = pnand %p831_p1, %p828_p0 }
   0x9   :  { %836 = shalt.err (!%p833_p2)
}
   0xa   :  { %s837_s29 = scalar_lea.vmem %s33_s19, 4096  ;;  %p842_p4 = scmp.lt.s32.totalorder %s33_s19, %s33_s19 }
   0xb   :  { %p838_p3 = scmp.ne.s32.totalorder %s33_s19, %s837_s29  ;;  %p843_p5 = scmp.lt.s32.totalorder %s837_s29, %s837_s29 }
   0xd   :  { %p844_p6 = por %p843_p5, %p842_p4 }
   0xf   :  { %p845_p7 = pnand %p844_p6, %p838_p3 }
  0x11   :  { %848 = shalt.err (!%p845_p7)
}
  0x12   :  { %s923_s30 = smov 128   ;;  %s924_s6 = smov 8  }
  0x13   :  { %38 = dma.hbm_to_vmem [thread:$0]  %s1074_s2, 4096, %s33_s19, [#allocation6], %s923_s30, %s923_s30, %s924_s6  }
  0x14   :  { %s849_s11 = scalar_lea.hbm %s1073_s1, 1024 }
  0x15   :  { %p850_p8 = scmp.ne.s32.totalorder %s1073_s1, %s849_s11  ;;  %p853_p9 = scmp.lt.u32.totalorder %s849_s11, %s1073_s1 }
  0x17   :  { %p855_p10 = pnand %p853_p9, %p850_p8 }
  0x19   :  { %858 = shalt.err (!%p855_p10)
}
  0x1a   :  { %s859_s16 = scalar_lea.vmem %s960_s21, 1024  ;;  %p864_p12 = scmp.lt.s32.totalorder %s960_s21, %s960_s21 }
  0x1b   :  { %p860_p11 = scmp.ne.s32.totalorder %s960_s21, %s859_s16  ;;  %p865_p13 = scmp.lt.s32.totalorder %s859_s16, %s859_s16 }
  0x1d   :  { %p866_p0 = por %p865_p13, %p864_p12 }
  0x1f   :  { %p867_p1 = pnand %p866_p0, %p860_p11 }
  0x21   :  { %870 = shalt.err (!%p867_p1)
}
  0x22   :  { %26 = dma.hbm_to_vmem [thread:$0]  %s1073_s1, 1024, %s960_s21, [#allocation4], %s923_s30, %s923_s30, %s924_s6  }
  0x23   :  { %s925_s18 = smov [#allocation7]   ;;  %s926_s20 = smov [#allocation8]  }
  0x24   :  { %s44_s19 = sshll.u32 %s925_s18, 4  ;;  %s57_s22 = sshll.u32 %s926_s20, 4  ;;  %s45_s19 = int_to_ptr.vmem [resolvable:$true] %s44_s19  ;;  %s58_s22 = int_to_ptr.vmem [resolvable:$true] %s57_s22 }
  0x25   :  { %s871_s25 = scalar_lea.hbm %s1075_s3, 2048 }
  0x26   :  { %p872_p2 = scmp.ne.s32.totalorder %s1075_s3, %s871_s25  ;;  %p875_p3 = scmp.lt.u32.totalorder %s871_s25, %s1075_s3 }
  0x28   :  { %p877_p4 = pnand %p875_p3, %p872_p2 }
  0x2a   :  { %880 = shalt.err (!%p877_p4)
}
  0x2b   :  { %s881_s1 = scalar_lea.vmem %s45_s19, 2048  ;;  %p886_p6 = scmp.lt.s32.totalorder %s45_s19, %s45_s19 }
  0x2c   :  { %p882_p5 = scmp.ne.s32.totalorder %s45_s19, %s881_s1  ;;  %p887_p7 = scmp.lt.s32.totalorder %s881_s1, %s881_s1 }
  0x2e   :  { %p888_p8 = por %p887_p7, %p886_p6 }
  0x30   :  { %p889_p9 = pnand %p888_p8, %p882_p5 }
  0x32   :  { %892 = shalt.err (!%p889_p9)
}
  0x33   :  { %50 = dma.hbm_to_vmem [thread:$0]  %s1075_s3, 2048, %s45_s19, [#allocation6], %s923_s30, %s923_s30, %s924_s6  }
  0x34   :  { %s893_s10 = scalar_lea.hbm %s1076_s4, 128 }
  0x35   :  { %p894_p10 = scmp.ne.s32.totalorder %s1076_s4, %s893_s10  ;;  %p897_p11 = scmp.lt.u32.totalorder %s893_s10, %s1076_s4 }
  0x37   :  { %p899_p12 = pnand %p897_p11, %p894_p10 }
  0x39   :  { %902 = shalt.err (!%p899_p12)
}
  0x3a   :  { %s903_s15 = scalar_lea.vmem %s58_s22, 128  ;;  %p908_p0 = scmp.lt.s32.totalorder %s58_s22, %s58_s22 }
  0x3b   :  { %p904_p13 = scmp.ne.s32.totalorder %s58_s22, %s903_s15  ;;  %p909_p1 = scmp.lt.s32.totalorder %s903_s15, %s903_s15 }
  0x3d   :  { %p910_p2 = por %p909_p1, %p908_p0 }
  0x3f   :  { %p911_p3 = pnand %p910_p2, %p904_p13 }
  0x41   :  { %914 = shalt.err (!%p911_p3)
}
  0x42   :  { %60 = dma.hbm_to_vmem [thread:$0]  %s1076_s4, 128, %s58_s22, [#allocation9]  }
  0x43   :  { %915 = dma.done.wait [#allocation4], 1024  }
  0x44   :  { %916 = vsyncadd [#allocation4], 4294966272 }
  0x45   :  { %917 = dma.done.wait [#allocation6], 6144  }
  0x46   :  { %918 = vsyncadd [#allocation6], 4294961152 }
  0x47   :  { %919 = dma.done.wait [#allocation9], 128  }
  0x48   :  { %920 = vsyncadd [#allocation9], 4294967168  ;;  %v927_v0 = vmov 0.0|0.0   ;;  %vm928_vm0 = vmmov 0   ;;  %v929_v1 = vmov 0.0   ;;  %v74_v2 = vld [vmem:[#allocation3] sm:$0xff] }
  0x49   :  { %734 = vmatprep.subr.bf16.mxu0 %v927_v0  ;;  %623 = vmatprep.mubr.msk.f32.mxu0 %vm928_vm0, %v929_v1  ;;  %v75_v3 = vld [vmem:[#allocation3 + $0x8] sm:$0xff]  ;;  %v76_v4 = vld [vmem:[#allocation3 + $0x10] sm:$0xff]  ;;  %v77_v6 = vld [vmem:[#allocation3 + $0x18] sm:$0xff]  ;;  %vm87_vm1 = vcmask 523264  }
  0x4a   :  { %746 = vmatprep.subr.bf16.mxu1 %v927_v0  ;;  %658 = vmatprep.mubr.msk.f32.mxu1 %vm928_vm0, %v929_v1  ;;  %v735_v5 = vpack.c.bf16 %v75_v3, %v74_v2  ;;  %v738_v7 = vpack.c.bf16 %v77_v6, %v76_v4  ;;  %v164_v8 = vld [vmem:[#allocation5] sm:$0xff]  ;;  %v165_v9 = vld [vmem:[#allocation5 + $0x8] sm:$0xff]  ;;  %v166_v10 = vld [vmem:[#allocation5 + $0x10] sm:$0xff] }
  0x4b   :  { %v78_v11 = vld [vmem:[#allocation3 + $0x20] sm:$0xff]  ;;  %v79_v12 = vld [vmem:[#allocation3 + $0x28] sm:$0xff]  ;;  %v747_v13 = vpack.c.bf16 %v165_v9, %v164_v8  ;;  %v167_v14 = vld [vmem:[#allocation5 + $0x18] sm:$0xff] }
  0x4c   :  { %736 = vmatpush3.bf16.msra.mxu0 %v735_v5  ;;  %v750_v15 = vpack.c.bf16 %v167_v14, %v166_v10  ;;  %v741_v16 = vpack.c.bf16 %v79_v12, %v78_v11  ;;  %v168_v17 = vld [vmem:[#allocation5 + $0x20] sm:$0xff]  ;;  %v169_v18 = vld [vmem:[#allocation5 + $0x28] sm:$0xff]  ;;  %v80_v19 = vld [vmem:[#allocation3 + $0x30] sm:$0xff] }
  0x4d   :  { %737 = vmatprep.subr.bf16.mxu0 %v927_v0  ;;  %748 = vmatpush3.bf16.msra.mxu1 %v747_v13  ;;  %v81_v20 = vld [vmem:[#allocation3 + $0x38] sm:$0xff]  ;;  %v753_v21 = vpack.c.bf16 %v169_v18, %v168_v17  ;;  %v170_v23 = vld [vmem:[#allocation5 + $0x30] sm:$0xff]  ;;  %v172_v27 = vld [vmem:[#allocation5 + $0x40] sm:$0xff] }
  0x4e   :  { %749 = vmatprep.subr.bf16.mxu1 %v927_v0  ;;  %v744_v22 = vpack.c.bf16 %v81_v20, %v80_v19  ;;  %v171_v24 = vld [vmem:[#allocation5 + $0x38] sm:$0xff]  ;;  %v173_v28 = vld [vmem:[#allocation5 + $0x48] sm:$0xff]  ;;  %v174_v30 = vld [vmem:[#allocation5 + $0x50] sm:$0xff] }
  0x4f   :  { %v756_v25 = vpack.c.bf16 %v171_v24, %v170_v23  ;;  %v73_v26 = vld [vmem:[%s1072_s0] sm:$0xff]  ;;  %v759_v29 = vpack.c.bf16 %v173_v28, %v172_v27  ;;  %v176_v33 = vld [vmem:[#allocation5 + $0x60] sm:$0xff]  ;;  %v177_v34 = vld [vmem:[#allocation5 + $0x68] sm:$0xff] }
  0x50   :  { %739 = vmatpush3.bf16.msra.mxu0 %v738_v7  ;;  %v175_v31 = vld [vmem:[#allocation5 + $0x58] sm:$0xff]  ;;  %v765_v35 = vpack.c.bf16 %v177_v34, %v176_v33  ;;  %v178_v36 = vld [vmem:[#allocation5 + $0x70] sm:$0xff]  ;;  %v259_v39 = vld [vmem:[#allocation5 + $0x80] sm:$0xff] }
  0x51   :  { %740 = vmatprep.subr.bf16.mxu0 %v927_v0  ;;  %751 = vmatpush3.bf16.msra.mxu1 %v750_v15  ;;  %v762_v32 = vpack.c.bf16 %v175_v31, %v174_v30  ;;  %v179_v37 = vld [vmem:[#allocation5 + $0x78] sm:$0xff]  ;;  %v260_v40 = vld [vmem:[#allocation5 + $0x88] sm:$0xff]  ;;  %v261_v41 = vld [vmem:[#allocation5 + $0x90] sm:$0xff] }
  0x52   :  { %752 = vmatprep.subr.bf16.mxu1 %v927_v0  ;;  %v768_v38 = vpack.c.bf16 %v179_v37, %v178_v36  ;;  %v771_v42 = vpack.c.bf16 %v260_v40, %v259_v39  ;;  %v262_v43 = vld [vmem:[#allocation5 + $0x98] sm:$0xff]  ;;  %v263_v45 = vld [vmem:[#allocation5 + $0xa0] sm:$0xff]  ;;  %v264_v46 = vld [vmem:[#allocation5 + $0xa8] sm:$0xff] }
  0x53   :  { %v774_v44 = vpack.c.bf16 %v262_v43, %v261_v41  ;;  %v777_v47 = vpack.c.bf16 %v264_v46, %v263_v45  ;;  %v265_v48 = vld [vmem:[#allocation5 + $0xb0] sm:$0xff]  ;;  %v266_v49 = vld [vmem:[#allocation5 + $0xb8] sm:$0xff]  ;;  %v267_v51 = vld [vmem:[#allocation5 + $0xc0] sm:$0xff] }
  0x54   :  { %742 = vmatpush3.bf16.msra.mxu0 %v741_v16  ;;  %v780_v50 = vpack.c.bf16 %v266_v49, %v265_v48  ;;  %v268_v52 = vld [vmem:[#allocation5 + $0xc8] sm:$0xff]  ;;  %v269_v54 = vld [vmem:[#allocation5 + $0xd0] sm:$0xff]  ;;  %v270_v55 = vld [vmem:[#allocation5 + $0xd8] sm:$0xff] }
  0x55   :  { %743 = vmatprep.subr.bf16.mxu0 %v927_v0  ;;  %754 = vmatpush3.bf16.msra.mxu1 %v753_v21  ;;  %v783_v53 = vpack.c.bf16 %v268_v52, %v267_v51  ;;  %v786_v56 = vpack.c.bf16 %v270_v55, %v269_v54  ;;  %v271_v57 = vld [vmem:[#allocation5 + $0xe0] sm:$0xff]  ;;  %v272_v58 = vld [vmem:[#allocation5 + $0xe8] sm:$0xff]  ;;  %v273_v3 = vld [vmem:[#allocation5 + $0xf0] sm:$0xff] }
  0x56   :  { %755 = vmatprep.subr.bf16.mxu1 %v927_v0  ;;  %v789_v59 = vpack.c.bf16 %v272_v58, %v271_v57  ;;  %v538_v60 = vld [vmem:[#allocation8] ss:$0 sm:$0xff]  ;;  %v274_v4 = vld [vmem:[#allocation5 + $0xf8] sm:$0xff]  ;;  %v353_v7 = vld [vmem:[#allocation7 + $0x8] sm:$0xff] }
  0x57   :  { %v792_v5 = vpack.c.bf16 %v274_v4, %v273_v3  ;;  %v352_v6 = vld [vmem:[#allocation7] sm:$0xff]  ;;  %v354_v8 = vld [vmem:[#allocation7 + $0x10] sm:$0xff]  ;;  %v355_v10 = vld [vmem:[#allocation7 + $0x18] sm:$0xff] }
  0x58   :  { %745 = vmatpush3.bf16.msra.mxu0 %v744_v22  ;;  %v795_v9 = vpack.c.bf16 %v353_v7, %v352_v6  ;;  %v798_v11 = vpack.c.bf16 %v355_v10, %v354_v8  ;;  %v356_v12 = vld [vmem:[#allocation7 + $0x20] sm:$0xff]  ;;  %v357_v13 = vld [vmem:[#allocation7 + $0x28] sm:$0xff]  ;;  %v358_v20 = vld [vmem:[#allocation7 + $0x30] sm:$0xff] }
  0x59   :  { %770 = vmatprep.subr.bf16.mxu0 %v927_v0  ;;  %757 = vmatpush3.bf16.msra.mxu1 %v756_v25  ;;  %v801_v14 = vpack.c.bf16 %v357_v13, %v356_v12  ;;  %v540_v15 = vld [vmem:[#allocation8 + $0x1] ss:$0 sm:$0xff]  ;;  %v359_v21 = vld [vmem:[#allocation7 + $0x38] sm:$0xff]  ;;  %v441_v24 = vld [vmem:[#allocation7 + $0x48] sm:$0xff] }
  0x5a   :  { %758 = vmatprep.subr.bf16.mxu1 %v927_v0  ;;  %v804_v22 = vpack.c.bf16 %v359_v21, %v358_v20  ;;  %v440_v23 = vld [vmem:[#allocation7 + $0x40] sm:$0xff]  ;;  %v442_v25 = vld [vmem:[#allocation7 + $0x50] sm:$0xff]  ;;  %v443_v27 = vld [vmem:[#allocation7 + $0x58] sm:$0xff] }
  0x5b   :  { %624 = vmatmul.mubr.msk.f32.vlgmr.msra.gmra.mrb[0].mxu0 %vm87_vm1, %v73_v26  ;;  %v807_v26 = vpack.c.bf16 %v441_v24, %v440_v23  ;;  %v810_v28 = vpack.c.bf16 %v443_v27, %v442_v25  ;;  %v445_v30 = vld [vmem:[#allocation7 + $0x68] sm:$0xff]  ;;  %v446_v36 = vld [vmem:[#allocation7 + $0x70] sm:$0xff]  ;;  %v447_v37 = vld [vmem:[#allocation7 + $0x78] sm:$0xff] }
  0x5c   :  { %693 = vmatprep.mubr.msk.f32.mxu0 %vm928_vm0, %v929_v1  ;;  %772 = vmatpush3.bf16.msra.mxu0 %v771_v42  ;;  %v542_v39 = vld [vmem:[#allocation8 + $0x3] ss:$0 sm:$0xff]  ;;  %v544_v45 = vld [vmem:[#allocation8 + $0x4] ss:$0 sm:$0xff] }
  0x5d   :  { %760 = vmatpush3.bf16.msra.mxu1 %v759_v29  ;;  %773 = vmatprep.subr.bf16.mxu0 %v927_v0  ;;  %v444_v29 = vld [vmem:[#allocation7 + $0x60] sm:$0xff] }
  0x5e   :  { %761 = vmatprep.subr.bf16.mxu1 %v927_v0  ;;  %v813_v31 = vpack.c.bf16 %v445_v30, %v444_v29 }
  0x60   :  { %775 = vmatpush3.bf16.msra.mxu0 %v774_v44  ;;  %v526_v44 = vlaneseq }
  0x61   :  { %763 = vmatpush3.bf16.msra.mxu1 %v762_v32  ;;  %776 = vmatprep.subr.bf16.mxu0 %v927_v0 }
  0x62   :  { %764 = vmatprep.subr.bf16.mxu1 %v927_v0 }
  0x64   :  { %778 = vmatpush3.bf16.msra.mxu0 %v777_v47 }
  0x65   :  { %766 = vmatpush3.bf16.msra.mxu1 %v765_v35  ;;  %779 = vmatprep.subr.bf16.mxu0 %v927_v0 }
  0x66   :  { %767 = vmatprep.subr.bf16.mxu1 %v927_v0 }
  0x68   :  { %781 = vmatpush3.bf16.msra.mxu0 %v780_v50 }
  0x69   :  { %769 = vmatpush3.bf16.msra.mxu1 %v768_v38  ;;  %782 = vmatprep.subr.bf16.mxu0 %v927_v0  ;;  %v816_v38 = vpack.c.bf16 %v447_v37, %v446_v36 }
  0x6a   :  { %794 = vmatprep.subr.bf16.mxu1 %v927_v0 }
  0x6c   :  { %784 = vmatpush3.bf16.msra.mxu0 %v783_v53 }
  0x6d   :  { %785 = vmatprep.subr.bf16.mxu0 %v927_v0 }
  0x70   :  { %787 = vmatpush3.bf16.msra.mxu0 %v786_v56 }
  0x71   :  { %788 = vmatprep.subr.bf16.mxu0 %v927_v0 }
  0x74   :  { %790 = vmatpush3.bf16.msra.mxu0 %v789_v59 }
  0x75   :  { %791 = vmatprep.subr.bf16.mxu0 %v927_v0 }
  0x78   :  { %793 = vmatpush3.bf16.msra.mxu0 %v792_v5 }
  0x79   :  { %806 = vmatprep.subr.bf16.mxu0 %v927_v0 }
 0x12e   :  { %v157_v61 = vpop.f32.mrb[0].mxu0 }
 0x12f   :  { %v158_v62 = vadd.f32 %v538_v60, %v157_v61  ;;  %v625_v63 = vpop.f32.mrb[1].mxu0 }
 0x131   :  { %v161_v2 = vmax.f32 %v158_v62, 0.0 }
 0x133   :  { %659 = vmatmul.mubr.f32.vlgmr.msra.gmra.mrb[0].mxu1 %v161_v2 }
 0x134   :  { %712 = vmatprep.mubr.msk.f32.mxu1 %vm928_vm0, %v929_v1  ;;  %796 = vmatpush3.bf16.msra.mxu1 %v795_v9 }
 0x135   :  { %797 = vmatprep.subr.bf16.mxu1 %v927_v0 }
 0x138   :  { %799 = vmatpush3.bf16.msra.mxu1 %v798_v11 }
 0x139   :  { %800 = vmatprep.subr.bf16.mxu1 %v927_v0 }
 0x13c   :  { %802 = vmatpush3.bf16.msra.mxu1 %v801_v14 }
 0x13d   :  { %803 = vmatprep.subr.bf16.mxu1 %v927_v0 }
 0x140   :  { %805 = vmatpush3.bf16.msra.mxu1 %v804_v22 }
 0x206   :  { %v251_v16 = vpop.f32.mrb[0].mxu1 }
 0x207   :  { %v252_v17 = vadd.f32 %v540_v15, %v251_v16  ;;  %v660_v18 = vpop.f32.mrb[1].mxu1 }
 0x209   :  { %v255_v19 = vmax.f32 %v252_v17, 0.0 }
 0x20b   :  { %694 = vmatmul.mubr.f32.vlgmr.msra.gmra.mrb[2].mxu0 %v255_v19 }
 0x20c   :  { %731 = vmatprep.mubr.msk.f32.mxu0 %vm928_vm0, %v929_v1  ;;  %808 = vmatpush3.bf16.msra.mxu0 %v807_v26  ;;  %v541_v1 = vld [vmem:[#allocation8 + $0x2] ss:$0 sm:$0xff] }
 0x20d   :  { %809 = vmatprep.subr.bf16.mxu0 %v927_v0 }
 0x210   :  { %811 = vmatpush3.bf16.msra.mxu0 %v810_v28 }
 0x211   :  { %812 = vmatprep.subr.bf16.mxu0 %v927_v0 }
 0x214   :  { %814 = vmatpush3.bf16.msra.mxu0 %v813_v31 }
 0x215   :  { %815 = vmatprep.subr.bf16.mxu0 %v927_v0  ;;  %v527_v0 = vand.u32 127, %v526_v44 }
 0x217   :  { %vm528_vm2 = vcmp.lt.s32.totalorder %v527_v0, 32 }
 0x218   :  { %817 = vmatpush3.bf16.msra.mxu0 %v816_v38 }
 0x2de   :  { %v341_v32 = vpop.f32.mrb[2].mxu0 }
 0x2df   :  { %v350_v33 = vadd.f32 %v541_v1, %v341_v32  ;;  %v695_v34 = vpop.f32.mrb[3].mxu0 }
 0x2e1   :  { %v351_v35 = vmax.f32 %v350_v33, 0.0 }
 0x2e3   :  { %713 = vmatmul.mubr.msk.f32.vlgmr.msra.gmra.mrb[2].mxu1 %vm87_vm1, %v351_v35 }
 0x3b6   :  { %v434_v40 = vpop.f32.mrb[2].mxu1 }
 0x3b7   :  { %v435_v41 = vadd.f32 %v542_v39, %v434_v40  ;;  %v714_v42 = vpop.f32.mrb[3].mxu1 }
 0x3b9   :  { %v438_v43 = vmax.f32 %v435_v41, 0.0 }
 0x3bb   :  { %732 = vmatmul.mubr.msk.f32.vlgmr.msra.gmra.mrb[4].mxu0 %vm87_vm1, %v438_v43 }
 0x48e   :  { %v522_v46 = vpop.f32.mrb[4].mxu0 }
 0x48f   :  { %v523_v47 = vadd.f32 %v544_v45, %v522_v46  ;;  %v733_v48 = vpop.f32.mrb[5].mxu0 }
 0x491   :  { %v529_v49 = vsel %vm528_vm2, %v350_v33, %v523_v47 }
 0x492   :  { %530 = vst.msk [vmem:[%s1077_s5] sm:$0xff] %vm87_vm1, %v529_v49 }
 0x493   :  { %535 = vsyncpa [#allocation4], 1 }
 0x494   :  { %536 = vsyncpa [#allocation6], 1 }
 0x495   :  { %537 = vsyncpa [#allocation9], 1 }

</bundles_post_ra>
